<compile_context>
chip_gen: v6e
topology: v6e:2x2x1
jax: 0.10.0
libtpu: 0.0.40
codegen_flags: <defaults>
</compile_context>

<pallas_src>
import functools

import jax
import jax.numpy as jnp
from jax.experimental import pallas as pl
from jax.experimental.pallas import tpu as pltpu

MAX_MAN = 26


def manpad_kernel(d_ref, o_ref, *, n_joints, n_person, max_man):
    """d_ref: (rt, V*M) real-person data; o_ref: (rt, V*max_man) padded."""
    pad = max_man - n_person
    # Zero-fill the lane-dense output block once (full-width stores).
    o_ref[...] = jnp.zeros(o_ref.shape, o_ref.dtype)
    # For each joint v, copy its M real persons into the LAST n_person lanes of
    # the joint's max_man-wide group (front-pad semantics).  Static contiguous
    # lane slices -> V narrow masked stores, no relayout, tiny live ranges.
    for v in range(n_joints):
        o_ref[:, v * max_man + pad:(v + 1) * max_man] = (
            d_ref[:, v * n_person:(v + 1) * n_person]
        )


def _pick_row_tile(rows, out_lanes, target_bytes=2 << 20):
    """8-aligned row tile: ~target_bytes f32 output block, >= 2 grid steps."""
    if rows <= 8:
        return rows  # single tiny full-extent block (legal: equals full dim)
    cap = max(8, (target_bytes // (out_lanes * 4)) // 8 * 8)
    half = max(8, (rows // 2) // 8 * 8)  # rt < rows  =>  >= 2 parallel steps
    return min(cap, half)


def man_pad(data, label, max_man=MAX_MAN):
    """data: (C, V, M, T) -> [front-padded + rearranged (C, T, V, max_man), label]."""
    C, V, M, T = data.shape
    assert M <= max_man, "more persons than max_man"

    data = data.astype(jnp.float32)
    # 'c v m t -> c t v m' on the small un-padded input; padding afterwards is
    # equivalent since both act on the persons axis.
    data_t = jnp.transpose(data, (0, 3, 1, 2))            # (C, T, V, M)

    rows = C * T
    in_lanes = V * M
    out_lanes = V * max_man
    flat = data_t.reshape(rows, in_lanes)                 # free contiguous reshape

    rt = _pick_row_tile(rows, out_lanes)
    grid = (pl.cdiv(rows, rt),)

    kernel = functools.partial(
        manpad_kernel, n_joints=V, n_person=M, max_man=max_man)

    bytes_accessed = rows * in_lanes * 4 + rows * out_lanes * 4

    out_flat = pl.pallas_call(
        kernel,
        out_shape=jax.ShapeDtypeStruct((rows, out_lanes), jnp.float32),
        grid=grid,
        in_specs=[pl.BlockSpec((rt, in_lanes), lambda r: (r, 0))],
        out_specs=pl.BlockSpec((rt, out_lanes), lambda r: (r, 0)),
        compiler_params=pltpu.CompilerParams(
            dimension_semantics=("parallel",),
        ),
        cost_estimate=pl.CostEstimate(
            flops=0, transcendentals=0, bytes_accessed=int(bytes_accessed)),
    )(flat)

    out = out_flat.reshape(C, T, V, max_man)              # free reshape back
    return [out, label]


if __name__ == "__main__":
    key = jax.random.PRNGKey(0)
    # small skeleton-like shapes: C=3 coords, V=17 joints, M=2 persons, T=8 frames
    C, V, M, T = 3, 17, 2, 8
    data = jax.random.normal(key, (C, V, M, T), dtype=jnp.float32)
    label = jnp.array(5, dtype=jnp.int32)

    out_data, out_label = man_pad(data, label)
    out_data = jax.block_until_ready(out_data)

    # reference (pure JAX) check of the exact PyTorch semantics
    ref = jnp.concatenate(
        [jnp.zeros((C, V, MAX_MAN - M, T), jnp.float32), data], axis=2
    )
    ref = jnp.transpose(ref, (0, 3, 1, 2))  # 'c v m t -> c t v m'

    assert out_data.shape == (C, T, V, MAX_MAN)
    assert out_data.dtype == jnp.float32
    assert jnp.allclose(out_data, ref), "mismatch vs reference"
    assert int(out_label) == 5

    print("KERNEL_OK")
</pallas_src>

<mosaic_0001>
module attributes {stable_mosaic.version = 11 : i64} {
  func.func @manpad_kernel(%arg0: i32, %arg1: memref<8x34xf32, #tpu.memory_space<vmem>>, %arg2: memref<8x442xf32, #tpu.memory_space<vmem>>) attributes {dimension_semantics = [#tpu.dimension_semantics<parallel>], iteration_bounds = array<i64: 3>, scalar_prefetch = 0 : i64, scratch_operands = 0 : i64, tpu.core_type = #tpu.core_type<tc>, window_params = [{transform_indices = @transform_0, window_bounds = array<i64: 8, 34>}, {transform_indices = @transform_1, window_bounds = array<i64: 8, 442>}]} {
    %cst = arith.constant 0.000000e+00 : f32
    %0 = vector.broadcast %cst : f32 to vector<8x442xf32>
    %c0 = arith.constant 0 : index
    %c0_0 = arith.constant 0 : index
    %1 = vector.load %arg2[%c0, %c0_0] : memref<8x442xf32, #tpu.memory_space<vmem>>, vector<8x442xf32>
    tpu.vector_store %arg2[%c0, %c0_0], %0 {strides = array<i32>} : memref<8x442xf32, #tpu.memory_space<vmem>>, vector<8x442xf32>,
    %c0_1 = arith.constant 0 : index
    %c0_2 = arith.constant 0 : index
    %2 = vector.load %arg1[%c0_1, %c0_2] : memref<8x34xf32, #tpu.memory_space<vmem>>, vector<8x2xf32>
    %c0_3 = arith.constant 0 : index
    %c24 = arith.constant 24 : index
    %3 = vector.load %arg2[%c0_3, %c24] : memref<8x442xf32, #tpu.memory_space<vmem>>, vector<8x2xf32>
    tpu.vector_store %arg2[%c0_3, %c24], %2 {strides = array<i32>} : memref<8x442xf32, #tpu.memory_space<vmem>>, vector<8x2xf32>,
    %c0_4 = arith.constant 0 : index
    %c2 = arith.constant 2 : index
    %4 = vector.load %arg1[%c0_4, %c2] : memref<8x34xf32, #tpu.memory_space<vmem>>, vector<8x2xf32>
    %c0_5 = arith.constant 0 : index
    %c50 = arith.constant 50 : index
    %5 = vector.load %arg2[%c0_5, %c50] : memref<8x442xf32, #tpu.memory_space<vmem>>, vector<8x2xf32>
    tpu.vector_store %arg2[%c0_5, %c50], %4 {strides = array<i32>} : memref<8x442xf32, #tpu.memory_space<vmem>>, vector<8x2xf32>,
    %c0_6 = arith.constant 0 : index
    %c4 = arith.constant 4 : index
    %6 = vector.load %arg1[%c0_6, %c4] : memref<8x34xf32, #tpu.memory_space<vmem>>, vector<8x2xf32>
    %c0_7 = arith.constant 0 : index
    %c76 = arith.constant 76 : index
    %7 = vector.load %arg2[%c0_7, %c76] : memref<8x442xf32, #tpu.memory_space<vmem>>, vector<8x2xf32>
    tpu.vector_store %arg2[%c0_7, %c76], %6 {strides = array<i32>} : memref<8x442xf32, #tpu.memory_space<vmem>>, vector<8x2xf32>,
    %c0_8 = arith.constant 0 : index
    %c6 = arith.constant 6 : index
    %8 = vector.load %arg1[%c0_8, %c6] : memref<8x34xf32, #tpu.memory_space<vmem>>, vector<8x2xf32>
    %c0_9 = arith.constant 0 : index
    %c102 = arith.constant 102 : index
    %9 = vector.load %arg2[%c0_9, %c102] : memref<8x442xf32, #tpu.memory_space<vmem>>, vector<8x2xf32>
    tpu.vector_store %arg2[%c0_9, %c102], %8 {strides = array<i32>} : memref<8x442xf32, #tpu.memory_space<vmem>>, vector<8x2xf32>,
    %c0_10 = arith.constant 0 : index
    %c8 = arith.constant 8 : index
    %10 = vector.load %arg1[%c0_10, %c8] : memref<8x34xf32, #tpu.memory_space<vmem>>, vector<8x2xf32>
    %c0_11 = arith.constant 0 : index
    %c128 = arith.constant 128 : index
    %11 = vector.load %arg2[%c0_11, %c128] : memref<8x442xf32, #tpu.memory_space<vmem>>, vector<8x2xf32>
    tpu.vector_store %arg2[%c0_11, %c128], %10 {strides = array<i32>} : memref<8x442xf32, #tpu.memory_space<vmem>>, vector<8x2xf32>,
    %c0_12 = arith.constant 0 : index
    %c10 = arith.constant 10 : index
    %12 = vector.load %arg1[%c0_12, %c10] : memref<8x34xf32, #tpu.memory_space<vmem>>, vector<8x2xf32>
    %c0_13 = arith.constant 0 : index
    %c154 = arith.constant 154 : index
    %13 = vector.load %arg2[%c0_13, %c154] : memref<8x442xf32, #tpu.memory_space<vmem>>, vector<8x2xf32>
    tpu.vector_store %arg2[%c0_13, %c154], %12 {strides = array<i32>} : memref<8x442xf32, #tpu.memory_space<vmem>>, vector<8x2xf32>,
    %c0_14 = arith.constant 0 : index
    %c12 = arith.constant 12 : index
    %14 = vector.load %arg1[%c0_14, %c12] : memref<8x34xf32, #tpu.memory_space<vmem>>, vector<8x2xf32>
    %c0_15 = arith.constant 0 : index
    %c180 = arith.constant 180 : index
    %15 = vector.load %arg2[%c0_15, %c180] : memref<8x442xf32, #tpu.memory_space<vmem>>, vector<8x2xf32>
    tpu.vector_store %arg2[%c0_15, %c180], %14 {strides = array<i32>} : memref<8x442xf32, #tpu.memory_space<vmem>>, vector<8x2xf32>,
    %c0_16 = arith.constant 0 : index
    %c14 = arith.constant 14 : index
    %16 = vector.load %arg1[%c0_16, %c14] : memref<8x34xf32, #tpu.memory_space<vmem>>, vector<8x2xf32>
    %c0_17 = arith.constant 0 : index
    %c206 = arith.constant 206 : index
    %17 = vector.load %arg2[%c0_17, %c206] : memref<8x442xf32, #tpu.memory_space<vmem>>, vector<8x2xf32>
    tpu.vector_store %arg2[%c0_17, %c206], %16 {strides = array<i32>} : memref<8x442xf32, #tpu.memory_space<vmem>>, vector<8x2xf32>,
    %c0_18 = arith.constant 0 : index
    %c16 = arith.constant 16 : index
    %18 = vector.load %arg1[%c0_18, %c16] : memref<8x34xf32, #tpu.memory_space<vmem>>, vector<8x2xf32>
    %c0_19 = arith.constant 0 : index
    %c232 = arith.constant 232 : index
    %19 = vector.load %arg2[%c0_19, %c232] : memref<8x442xf32, #tpu.memory_space<vmem>>, vector<8x2xf32>
    tpu.vector_store %arg2[%c0_19, %c232], %18 {strides = array<i32>} : memref<8x442xf32, #tpu.memory_space<vmem>>, vector<8x2xf32>,
    %c0_20 = arith.constant 0 : index
    %c18 = arith.constant 18 : index
    %20 = vector.load %arg1[%c0_20, %c18] : memref<8x34xf32, #tpu.memory_space<vmem>>, vector<8x2xf32>
    %c0_21 = arith.constant 0 : index
    %c258 = arith.constant 258 : index
    %21 = vector.load %arg2[%c0_21, %c258] : memref<8x442xf32, #tpu.memory_space<vmem>>, vector<8x2xf32>
    tpu.vector_store %arg2[%c0_21, %c258], %20 {strides = array<i32>} : memref<8x442xf32, #tpu.memory_space<vmem>>, vector<8x2xf32>,
    %c0_22 = arith.constant 0 : index
    %c20 = arith.constant 20 : index
    %22 = vector.load %arg1[%c0_22, %c20] : memref<8x34xf32, #tpu.memory_space<vmem>>, vector<8x2xf32>
    %c0_23 = arith.constant 0 : index
    %c284 = arith.constant 284 : index
    %23 = vector.load %arg2[%c0_23, %c284] : memref<8x442xf32, #tpu.memory_space<vmem>>, vector<8x2xf32>
    tpu.vector_store %arg2[%c0_23, %c284], %22 {strides = array<i32>} : memref<8x442xf32, #tpu.memory_space<vmem>>, vector<8x2xf32>,
    %c0_24 = arith.constant 0 : index
    %c22 = arith.constant 22 : index
    %24 = vector.load %arg1[%c0_24, %c22] : memref<8x34xf32, #tpu.memory_space<vmem>>, vector<8x2xf32>
    %c0_25 = arith.constant 0 : index
    %c310 = arith.constant 310 : index
    %25 = vector.load %arg2[%c0_25, %c310] : memref<8x442xf32, #tpu.memory_space<vmem>>, vector<8x2xf32>
    tpu.vector_store %arg2[%c0_25, %c310], %24 {strides = array<i32>} : memref<8x442xf32, #tpu.memory_space<vmem>>, vector<8x2xf32>,
    %c0_26 = arith.constant 0 : index
    %c24_27 = arith.constant 24 : index
    %26 = vector.load %arg1[%c0_26, %c24_27] : memref<8x34xf32, #tpu.memory_space<vmem>>, vector<8x2xf32>
    %c0_28 = arith.constant 0 : index
    %c336 = arith.constant 336 : index
    %27 = vector.load %arg2[%c0_28, %c336] : memref<8x442xf32, #tpu.memory_space<vmem>>, vector<8x2xf32>
    tpu.vector_store %arg2[%c0_28, %c336], %26 {strides = array<i32>} : memref<8x442xf32, #tpu.memory_space<vmem>>, vector<8x2xf32>,
    %c0_29 = arith.constant 0 : index
    %c26 = arith.constant 26 : index
    %28 = vector.load %arg1[%c0_29, %c26] : memref<8x34xf32, #tpu.memory_space<vmem>>, vector<8x2xf32>
    %c0_30 = arith.constant 0 : index
    %c362 = arith.constant 362 : index
    %29 = vector.load %arg2[%c0_30, %c362] : memref<8x442xf32, #tpu.memory_space<vmem>>, vector<8x2xf32>
    tpu.vector_store %arg2[%c0_30, %c362], %28 {strides = array<i32>} : memref<8x442xf32, #tpu.memory_space<vmem>>, vector<8x2xf32>,
    %c0_31 = arith.constant 0 : index
    %c28 = arith.constant 28 : index
    %30 = vector.load %arg1[%c0_31, %c28] : memref<8x34xf32, #tpu.memory_space<vmem>>, vector<8x2xf32>
    %c0_32 = arith.constant 0 : index
    %c388 = arith.constant 388 : index
    %31 = vector.load %arg2[%c0_32, %c388] : memref<8x442xf32, #tpu.memory_space<vmem>>, vector<8x2xf32>
    tpu.vector_store %arg2[%c0_32, %c388], %30 {strides = array<i32>} : memref<8x442xf32, #tpu.memory_space<vmem>>, vector<8x2xf32>,
    %c0_33 = arith.constant 0 : index
    %c30 = arith.constant 30 : index
    %32 = vector.load %arg1[%c0_33, %c30] : memref<8x34xf32, #tpu.memory_space<vmem>>, vector<8x2xf32>
    %c0_34 = arith.constant 0 : index
    %c414 = arith.constant 414 : index
    %33 = vector.load %arg2[%c0_34, %c414] : memref<8x442xf32, #tpu.memory_space<vmem>>, vector<8x2xf32>
    tpu.vector_store %arg2[%c0_34, %c414], %32 {strides = array<i32>} : memref<8x442xf32, #tpu.memory_space<vmem>>, vector<8x2xf32>,
    %c0_35 = arith.constant 0 : index
    %c32 = arith.constant 32 : index
    %34 = vector.load %arg1[%c0_35, %c32] : memref<8x34xf32, #tpu.memory_space<vmem>>, vector<8x2xf32>
    %c0_36 = arith.constant 0 : index
    %c440 = arith.constant 440 : index
    %35 = vector.load %arg2[%c0_36, %c440] : memref<8x442xf32, #tpu.memory_space<vmem>>, vector<8x2xf32>
    tpu.vector_store %arg2[%c0_36, %c440], %34 {strides = array<i32>} : memref<8x442xf32, #tpu.memory_space<vmem>>, vector<8x2xf32>,
    return
  }
  func.func @transform_0(%arg0: i32) -> (i32, i32) {
    %c0_i32 = arith.constant 0 : i32
    %c0_i32_0 = arith.constant 0 : i32
    return %arg0, %c0_i32 : i32, i32
  }
  func.func @transform_1(%arg0: i32) -> (i32, i32) {
    %c0_i32 = arith.constant 0 : i32
    %c0_i32_0 = arith.constant 0 : i32
    return %arg0, %c0_i32 : i32, i32
  }
}

</mosaic_0001>

<bundles_post_ra>
// kernel: tpu_custom_call.1
= control target key start
LH: loop header
LB: loop body
LE: loop exit
PB: predicated region body
PF: predicated region fallthrough
CT: control target
= control target key end

     0   :  { %6 = vsyncpa [#allocation3], 0  ;;  %s732_s0 = inlined_call_operand.hbm [shape: f32[24,34], index: 0, kind: input, shape index: {}]   ;;  %s733_s1 = inlined_call_operand.hbm [shape: f32[24,442], index: 1, kind: output, shape index: {}]  }
   0x1   :  { %8 = vsyncpa [#allocation3 + $0x1], 0 }
   0x2   :  { %9 = vsyncpa [#allocation4], 0 }
   0x3   :  { %11 = vsyncpa [#allocation4 + $0x1], 0  ;;  %s535_s6 = smov 0   ;;  %s537_s7 = smov 0  }
   0x4   :  { %s539_s8 = smov 0   ;;  %s541_s9 = smov 0  }
   0x5 LB: > { %s556_s10 = sadd.s32 4294967295, %s505_s9   ;;  %s337_s11 = sadd.s32 4294967294, %s505_s9   ;;  %s505_s9 = sphi %s541_s9, %s749_s9   ;;  %s501_s8 = sphi %s539_s8, %s748_s8   ;;  %s497_s7 = sphi %s537_s7, %s747_s7   ;;  %s493_s6 = sphi %s535_s6, %s746_s6  }
   0x6   : > { %s560_s12 = sadd.s32 1, %s505_s9   ;;  %s24_s13 = sadd.s32 1, %s501_s8 }
   0x7   : > { %s21_s14 = ssub.s32 %s505_s9, %s560_s12  ;;  %p31_p0 = scmp.ne.s32.totalorder %s501_s8, %s497_s7 }
   0x8   : > { %p22_p1 = scmp.eq.s32.totalorder %s21_s14, 0  ;;  %p32_p2 = scmp.eq.s32.totalorder %s505_s9, 0 }
   0x9   : > { %p37_p3 = scmp.ne.s32.totalorder %s497_s7, %s493_s6  ;;  %p38_p4 = scmp.eq.s32.totalorder %s556_s10, 0 }
   0xa   : > { %s572_s15 = scalar_select %p22_p1, %s501_s8, %s24_s13  }
   0xb   : > { %p574_p5 = por %p32_p2, %p31_p0  ;;  %p578_p6 = por %p38_p4, %p37_p3 }
   0xc   : > { %p61_p7 = scmp.eq.s32.totalorder %s556_s10, 2  ;;  %p67_p8 = scmp.eq.s32.totalorder %s337_s11, 2 }
   0xd   : > { %s737_s17 = scalar_select %p578_p6, 1, 0 }
   0xe   : > { %p363_p9 = scmp.lt.s32.totalorder %s505_s9, 3  ;;  %p584_p10 = por %p61_p7, %p31_p0 }
   0xf   : > { %p588_p11 = por %p67_p8, %p37_p3  ;;  %s87_s20 = sand.u32 1, %s501_s8  }
  0x10   : > { %s738_s18 = scalar_select %p584_p10, 1, 0 }
  0x11   : > { %s739_s19 = scalar_select %p588_p11, 1, 0 }
  0x12   : > { %s341_s21 = sshll.u32 %s505_s9, 7  ;;  %s340_s22 = sshll.u32 %s87_s20, 3 }
  0x13   : > { %s597_s25 = scalar_lea.hbm %s732_s0, %s341_s21  ;;  %s91_s26 = scalar_lea.vmem [#allocation2], %s340_s22 }
  0x14   : > { %s98_s27 = sshll.u32 %s91_s26, 4  ;;  %p601_p12 = pnand %p363_p9, %p574_p5  ;;  %s605_s27 = int_to_ptr.vmem [resolvable:$true] %s98_s27 }
  0x15   : > { %s88_s29 = scalar_lea.sflag [#allocation3], %s87_s20  ;;  %s413_s30 = scalar_lea.hbm %s597_s25, 128 }
  0x16   : > { %p414_p1 = scmp.ne.s32.totalorder %s597_s25, %s413_s30  ;;  %p415_p2 = pneg %p601_p12 }
  0x17   : > { %s418_s4 = scalar_lea.hbm %s732_s0, 384  ;;  %p419_p5 = scmp.lt.s32.totalorder %s597_s25, %s732_s0 }
  0x18   : > { %p416_p3 = pnand %p415_p2, %p414_p1  ;;  %p420_p7 = scmp.lt.s32.totalorder %s418_s4, %s413_s30 }
  0x1a   : > { %p417_p4 = pneg %p416_p3  ;;  %p421_p8 = por %p420_p7, %p419_p5 }
  0x1c   : > { %p422_p9 = pnand %p421_p8, %p417_p4 }
  0x1e   : > { %425 = shalt.err (!%p422_p9)
}
  0x1f   : > { %s426_s13 = scalar_lea.vmem %s605_s27, 128  ;;  %s507_s14 = smov [#allocation2]  }
  0x20   : > { %p427_p13 = scmp.ne.s32.totalorder %s605_s27, %s426_s13  ;;  %s431_s16 = sshll.u32 %s507_s14, 4  ;;  %s432_s16 = int_to_ptr.vmem [resolvable:$false] %s431_s16 }
  0x21   : > { %s433_s20 = scalar_lea.vmem %s432_s16, 256  ;;  %p434_p3 = scmp.lt.s32.totalorder %s605_s27, %s432_s16 }
  0x22   : > { %p429_p0 = pnand %p427_p13, %p415_p2  ;;  %p435_p11 = scmp.lt.s32.totalorder %s433_s20, %s426_s13 }
  0x24   : > { %p430_p1 = pneg %p429_p0  ;;  %p436_p10 = por %p435_p11, %p434_p3 }
  0x26   : > { %p437_p6 = pnand %p436_p10, %p430_p1 }
  0x28   : > { %440 = shalt.err (!%p437_p6)
}
  0x29   : > { %358 = dma.hbm_to_vmem [thread:$0]  (!%p601_p12), %s597_s25, 128, %s605_s27, %s88_s29  }
  0x2a   : > { %p741_p4 = scmp.lt.s32.totalorder %s505_s9, 4  ;;  %p742_p5 = scmp.ge.s32.totalorder %s505_s9, 1 }
  0x2c   : > { %p104_p13 = pnand %p742_p5, %p741_p4 }
  0x2d   : > { %s632_s21 = sand.u32 (!%p104_p13), 1, %s497_s7   ;;  %p743_p6 = scmp.ne.s32.totalorder (!%p104_p13), %s737_s17, 0 }
  0x2e   : > { %107 = sbr.rel (%p104_p13) target bundleno = 210 (0xd2), region = 24  ;;  %s343_s22 = sshll.u32 (!%p104_p13), %s632_s21, 3 }
  0x2f   : > { %s110_s23 = scalar_lea.sflag (!%p104_p13), [#allocation3], %s632_s21  ;;  %s113_s24 = scalar_lea.vmem (!%p104_p13), [#allocation2], %s343_s22 }
  0x33   : > { %484 = dma.done.wait (%p743_p6), %s110_s23, 128  }
  0x34   : > { %486 = vsyncadd (%p743_p6), %s110_s23, 4294967168  ;;  %v640_v0 = vld [vmem:[%s113_s24] sm:$0xff]  ;;  %s344_s25 = sshll.u32 %s632_s21, 5  ;;  %vm135_vm0 = vcmask 474112   ;;  %s508_s26 = smov 120   ;;  %v510_v1 = vmov 0.0  }
  0x35   : > { %167 = vrot.lane.b32.xlu0 %v640_v0, %s508_s26  ;;  %s509_s27 = smov 24   ;;  %s646_s28 = scalar_lea.vmem [#allocation5], %s344_s25  ;;  %vm170_vm1 = vcmask 15360   ;;  %vm142_vm2 = vcmask 212160   ;;  %vm205_vm3 = vcmask 31760   ;;  %vm177_vm4 = vcmask 228560  }
  0x36   : > { %139 = vrot.lane.b32.xlu1 %v640_v0, %s509_s27  ;;  %133 = vst [vmem:[%s646_s28 + $0x8] sm:$0xff] %v510_v1  ;;  %132 = vst [vmem:[%s646_s28] sm:$0xff] %v510_v1  ;;  %s511_s17 = smov 112   ;;  %s512_s29 = smov 16   ;;  %vm212_vm5 = vcmask 244960   ;;  %vm149_vm6 = vcmask 425360   ;;  %vm184_vm7 = vcmask 441760  }
  0x37   : > { %134 = vst [vmem:[%s646_s28 + $0x10] sm:$0xff] %v510_v1  ;;  %136 = vst.msk [vmem:[%s646_s28 + $0x18] sm:$0xff] %vm135_vm0, %v510_v1  ;;  %s513_s30 = smov 8   ;;  %s514_s2 = smov 48   ;;  %vm219_vm8 = vcmask 458160   ;;  %vm240_vm9 = vcmask 48160  }
  0x38   : > { %s515_s3 = smov 40   ;;  %s516_s4 = smov 32   ;;  %vm156_vm10 = vcmask 638560   ;;  %vm243_vm11 = vcmask 261360   ;;  %vm191_vm12 = vcmask 654960   ;;  %vm226_vm13 = vcmask 671360  }
  0x39   : > { %202 = vrot.lane.b32.xlu0 %v640_v0, %s511_s17  ;;  %s517_s5 = smov 104   ;;  %s518_s11 = smov 72   ;;  %vm163_vm14 = vcmask 851760   ;;  %vm198_vm15 = vcmask 868160   ;;  %vm233_vm0 = vcmask 884560  }
  0x3a   : > { %174 = vrot.lane.b32.xlu1 %v640_v0, %s512_s29  ;;  %s519_s13 = smov 64   ;;  %s520_s14 = smov 56  }
  0x3b   : > { %s521_s16 = smov 96   ;;  %s522_s20 = smov 88  }
  0x3c   : > { %s523_s22 = smov 80   ;;  %s350_s23 = sshll.u32 %s556_s10, 9 }
  0x3d   : > { %209 = vrot.lane.b32.xlu0 %v640_v0, %s513_s30  ;;  %s267_s24 = sshll.u32 %s646_s28, 4  ;;  %s253_s10 = scalar_lea.sflag [#allocation4], %s632_s21  ;;  %s690_s24 = int_to_ptr.vmem [resolvable:$true] %s267_s24 }
  0x3e   : > { %146 = vrot.lane.b32.xlu1 %v640_v0, %s514_s2  ;;  %s441_s17 = scalar_lea.vmem %s690_s24, 512  ;;  %p744_p11 = scmp.ne.s32.totalorder %s738_s18, 0 }
  0x3f   : > { %p442_p10 = scmp.ne.s32.totalorder %s690_s24, %s441_s17  ;;  %s524_s29 = smov [#allocation5]  }
  0x40   : > { %s445_s30 = sshll.u32 %s524_s29, 4  ;;  %s446_s30 = int_to_ptr.vmem [resolvable:$false] %s445_s30 }
  0x41   : > { %181 = vrot.lane.b32.xlu0 %v640_v0, %s515_s3  ;;  %p443_p12 = pnand %p442_p10, %p744_p11  ;;  %s447_s2 = scalar_lea.vmem %s446_s30, 1024 }
  0x42   : > { %216 = vrot.lane.b32.xlu1 %v640_v0, %s516_s4  ;;  %p448_p2 = scmp.lt.s32.totalorder %s690_s24, %s446_s30  ;;  %p449_p7 = scmp.lt.s32.totalorder %s447_s2, %s441_s17 }
  0x43   : > { %p444_p0 = pneg %p443_p12 }
  0x44   : > { %p450_p8 = por %p449_p7, %p448_p2 }
  0x45   : > { %237 = vrot.lane.b32.xlu0 %v640_v0, %s517_s5 }
  0x46   : > { %153 = vrot.lane.b32.xlu1 %v640_v0, %s518_s11  ;;  %p451_p9 = pnand %p450_p8, %p444_p0 }
  0x49   : > { %188 = vrot.lane.b32.xlu0 %v640_v0, %s519_s13 }
  0x4a   : > { %223 = vrot.lane.b32.xlu1 %v640_v0, %s520_s14 }
  0x4d   : > { %160 = vrot.lane.b32.xlu0 %v640_v0, %s521_s16 }
  0x4e   : > { %195 = vrot.lane.b32.xlu1 %v640_v0, %s522_s20 }
  0x51   : > { %230 = vrot.lane.b32.xlu0 %v640_v0, %s523_s22 }
  0x52   : > { %247 = vrot.lane.b32.xlu1 %v640_v0, %s509_s27  ;;  %s688_s27 = scalar_lea.hbm %s733_s1, %s350_s23 }
  0xa7   : > { %v168_v2 = vpop.permute.xlu0 %167 }
  0xa8   : > { %v140_v3 = vpop.permute.xlu1 %139  ;;  %171 = vst.msk [vmem:[%s646_s28 + $0x8] sm:$0xff] %vm170_vm1, %v168_v2  ;;  %vm250_vm1 = vcmask 474560  }
  0xa9   : > { %143 = vst.msk [vmem:[%s646_s28] sm:$0xff] %vm142_vm2, %v140_v3 }
  0xab   : > { %v203_v4 = vpop.permute.xlu0 %202 }
  0xac   : > { %v175_v5 = vpop.permute.xlu1 %174  ;;  %206 = vst.msk [vmem:[%s646_s28 + $0x10] sm:$0xff] %vm205_vm3, %v203_v4 }
  0xad   : > { %178 = vst.msk [vmem:[%s646_s28 + $0x8] sm:$0xff] %vm177_vm4, %v175_v5 }
  0xaf   : > { %v210_v6 = vpop.permute.xlu0 %209 }
  0xb0   : > { %v147_v7 = vpop.permute.xlu1 %146  ;;  %213 = vst.msk [vmem:[%s646_s28 + $0x10] sm:$0xff] %vm212_vm5, %v210_v6 }
  0xb1   : > { %150 = vst.msk [vmem:[%s646_s28] sm:$0xff] %vm149_vm6, %v147_v7 }
  0xb3   : > { %v182_v8 = vpop.permute.xlu0 %181 }
  0xb4   : > { %v217_v9 = vpop.permute.xlu1 %216  ;;  %185 = vst.msk [vmem:[%s646_s28 + $0x8] sm:$0xff] %vm184_vm7, %v182_v8 }
  0xb5   : > { %220 = vst.msk [vmem:[%s646_s28 + $0x10] sm:$0xff] %vm219_vm8, %v217_v9 }
  0xb7   : > { %v238_v10 = vpop.permute.xlu0 %237 }
  0xb8   : > { %v154_v11 = vpop.permute.xlu1 %153  ;;  %241 = vst.msk [vmem:[%s646_s28 + $0x18] sm:$0xff] %vm240_vm9, %v238_v10 }
  0xb9   : > { %157 = vst.msk [vmem:[%s646_s28] sm:$0xff] %vm156_vm10, %v154_v11 }
  0xba   : > { %244 = vst.msk [vmem:[%s646_s28 + $0x18] sm:$0xff] %vm243_vm11, %v640_v0 }
  0xbb   : > { %v189_v12 = vpop.permute.xlu0 %188 }
  0xbc   : > { %v224_v13 = vpop.permute.xlu1 %223  ;;  %192 = vst.msk [vmem:[%s646_s28 + $0x8] sm:$0xff] %vm191_vm12, %v189_v12 }
  0xbd   : > { %227 = vst.msk [vmem:[%s646_s28 + $0x10] sm:$0xff] %vm226_vm13, %v224_v13 }
  0xbf   : > { %v161_v14 = vpop.permute.xlu0 %160 }
  0xc0   : > { %v196_v15 = vpop.permute.xlu1 %195  ;;  %164 = vst.msk [vmem:[%s646_s28] sm:$0xff] %vm163_vm14, %v161_v14 }
  0xc1   : > { %199 = vst.msk [vmem:[%s646_s28 + $0x8] sm:$0xff] %vm198_vm15, %v196_v15 }
  0xc3   : > { %v231_v16 = vpop.permute.xlu0 %230 }
  0xc4   : > { %v248_v17 = vpop.permute.xlu1 %247  ;;  %234 = vst.msk [vmem:[%s646_s28 + $0x10] sm:$0xff] %vm233_vm0, %v231_v16 }
  0xc5   : > { %251 = vst.msk [vmem:[%s646_s28 + $0x18] sm:$0xff] %vm250_vm1, %v248_v17 }
  0xc6   : > { %454 = shalt.err (!%p451_p9)
}
  0xc7   : > { %s455_s28 = scalar_lea.hbm %s688_s27, 512  ;;  %s459_s4 = scalar_lea.hbm %s733_s1, 1536 }
  0xc8   : > { %p456_p1 = scmp.ne.s32.totalorder %s688_s27, %s455_s28  ;;  %p460_p5 = scmp.lt.s32.totalorder %s688_s27, %s733_s1 }
  0xc9   : > { %p461_p13 = scmp.lt.s32.totalorder %s459_s4, %s455_s28 }
  0xca   : > { %p457_p3 = pnand %p456_p1, %p744_p11 }
  0xcb   : > { %p462_p6 = por %p461_p13, %p460_p5 }
  0xcc   : > { %p458_p4 = pneg %p457_p3 }
  0xce   : > { %p463_p10 = pnand %p462_p6, %p458_p4 }
  0xd0   : > { %466 = shalt.err (!%p463_p10)
}
  0xd1   : > { %353 = dma.vmem_to_hbm [thread:$0]  (%p744_p11), %s690_s24, 512, %s688_s27, %s253_s10  }
  0xd2 PF: > { %p364_p12 = scmp.ge.s32.totalorder %s505_s9, 2  ;;  %s279_s13 = sand.u32 1, %s493_s6  }
  0xd3   : > { %p745_p0 = scmp.ne.s32.totalorder %s739_s19, 0  ;;  %s280_s14 = scalar_lea.sflag [#allocation4], %s279_s13 }
  0xd5   : > { %p360_p2 = pnand %p364_p12, %p745_p0 }
  0xd7   : > { %p361_p7 = pneg %p360_p2 }
  0xd9   : > { %488 = dma.done.wait (%p361_p7), %s280_s14, 512  }
  0xda   : > { %490 = vsyncadd (%p361_p7), %s280_s14, 4294966784  ;;  %p14_p8 = scmp.ge.s32.totalorder %s560_s12, 5   ;;  %s746_s6 = smov %s497_s7 }
  0xdb   : > { %s747_s7 = smov %s501_s8  ;;  %s748_s8 = smov %s572_s15 }
  0xdc   : > { %s749_s9 = smov %s560_s12  ;;  %16 = sbr.rel (!%p14_p8) target bundleno = 5 (0x5), region = 69 }
  0xe1   :  { %285 = vsyncpa [#allocation3], 1 }
  0xe2   :  { %287 = vsyncpa [#allocation3 + $0x1], 1 }
  0xe3   :  { %288 = vsyncpa [#allocation4], 1 }
  0xe4   :  { %290 = vsyncpa [#allocation4 + $0x1], 1 }

</bundles_post_ra>
